<compile_context>
chip_gen: v5e
topology: v5e:2x2
jax: 0.10.0
libtpu: 0.0.40
codegen_flags: <defaults>
</compile_context>

<pallas_src>
import functools

import jax
import jax.numpy as jnp
from jax.experimental import pallas as pl
from jax.experimental.pallas import tpu as pltpu

LANE = 128
SUBLANE = 16  # bf16 sublane packing (2 rows per 8-sublane group)


def _round_up(n, m):
    return ((n + m - 1) // m) * m


def mlp_kernel(x_ref, w1_ref, b1_ref, w2_ref, b2_ref, w3_ref, b3_ref, o_ref):
    """h1 = relu(x@W1+b1); h2 = relu(h1@W2+b2); out = h2@W3+b3 (f32 accum)."""
    x = x_ref[...]

    # Layer 1: Linear + ReLU (MXU bf16 x bf16 -> f32 accumulator), then cast
    # back to bf16 immediately to shorten the f32 live range.
    h1 = jnp.dot(x, w1_ref[...], preferred_element_type=jnp.float32)
    h1 = jnp.maximum(h1 + b1_ref[...], 0.0).astype(w2_ref.dtype)

    # Layer 2: Linear + ReLU
    h2 = jnp.dot(h1, w2_ref[...], preferred_element_type=jnp.float32)
    h2 = jnp.maximum(h2 + b2_ref[...], 0.0).astype(w3_ref.dtype)

    # Layer 3: Linear (logits, no activation)
    out = jnp.dot(h2, w3_ref[...], preferred_element_type=jnp.float32)
    o_ref[...] = (out + b3_ref[...]).astype(o_ref.dtype)


def prepare_params(w1, b1, w2, b2, w3, b3, *, compute_dtype=jnp.bfloat16):
    """One-time padding + cast of the weights (hoisted out of the forward).

    Weights must already be transposed to (in, out) — x @ W convention.
    Zero padding is exact: padded hidden units have zero weights/biases and
    stay 0 through ReLU; padded class columns are sliced off in the forward.
    """
    in_f, hid = w1.shape
    ncls = w3.shape[1]
    cd = compute_dtype

    in_p = _round_up(in_f, 8)       # layer-1 K: sublane-align only
    hid_p = _round_up(hid, LANE)    # lane-dense hidden
    out_p = _round_up(ncls, LANE)   # lane-dense logits (unmasked vst)

    w1_p = jnp.zeros((in_p, hid_p), cd).at[:in_f, :hid].set(w1.astype(cd))
    w2_p = jnp.zeros((hid_p, hid_p), cd).at[:hid, :hid].set(w2.astype(cd))
    w3_p = jnp.zeros((hid_p, out_p), cd).at[:hid, :ncls].set(w3.astype(cd))
    # Biases stay f32: added to the f32 accumulator in-kernel.
    b1_p = jnp.zeros((1, hid_p), jnp.float32).at[0, :hid].set(b1.astype(jnp.float32))
    b2_p = jnp.zeros((1, hid_p), jnp.float32).at[0, :hid].set(b2.astype(jnp.float32))
    b3_p = jnp.zeros((1, out_p), jnp.float32).at[0, :ncls].set(b3.astype(jnp.float32))
    return w1_p, b1_p, w2_p, b2_p, w3_p, b3_p


@functools.partial(jax.jit, static_argnames=("num_classes", "block_m"))
def neural_net_forward(x, w1_p, b1_p, w2_p, b2_p, w3_p, b3_p, *,
                       num_classes, block_m=256):
    """x: (B, input_size) f32; params already padded/cast via prepare_params."""
    B, in_f = x.shape
    in_p, hid_p = w1_p.shape
    out_p = w3_p.shape[1]
    cd = w1_p.dtype
    cd_bytes = jnp.dtype(cd).itemsize

    # Batch tile: sublane-aligned (16 for bf16), NOT padded to 128.
    bm = min(block_m, _round_up(B, SUBLANE))
    # If the whole batch would be one tile, split it so the "parallel" grid
    # axis actually uses both v7x TensorCores.
    if _round_up(B, bm) == bm and bm % (2 * SUBLANE) == 0 and B > SUBLANE:
        bm //= 2
    b_p = _round_up(B, bm)
    num_tiles = b_p // bm

    # Per-call activation padding only (weights are already padded).
    x_p = jnp.zeros((b_p, in_p), cd).at[:B, :in_f].set(x.astype(cd))

    # Resident (weight-stationary) operands: constant index map + single buffer.
    def resident(shape):
        return pl.BlockSpec(shape, lambda i: (0, 0), pipeline_mode=pl.Buffered(1))

    # VMEM budget: single-buffered weights + double-buffered x/out tiles +
    # f32 intermediates, with ~30% headroom.
    weight_bytes = (in_p * hid_p + hid_p * hid_p + hid_p * out_p) * cd_bytes
    bias_bytes = (2 * hid_p + out_p) * 4
    x_tile_bytes = 2 * bm * in_p * cd_bytes
    out_tile_bytes = 2 * bm * out_p * 4
    interm_bytes = 2 * bm * hid_p * 4
    vmem_limit = int(1.3 * (weight_bytes + bias_bytes + x_tile_bytes
                            + out_tile_bytes + interm_bytes))
    vmem_limit = max(vmem_limit, 16 * 1024 * 1024)
    vmem_limit = min(vmem_limit, 48 * 1024 * 1024)  # stay under v7x 64 MiB/TC

    flops = 2 * b_p * (in_p * hid_p + hid_p * hid_p + hid_p * out_p)
    bytes_accessed = (weight_bytes + bias_bytes
                      + b_p * in_p * cd_bytes + b_p * out_p * 4)
    cost = pl.CostEstimate(flops=flops, transcendentals=0,
                           bytes_accessed=bytes_accessed)

    out_padded = pl.pallas_call(
        mlp_kernel,
        out_shape=jax.ShapeDtypeStruct((b_p, out_p), jnp.float32),
        grid_spec=pl.GridSpec(
            grid=(num_tiles,),
            in_specs=[
                pl.BlockSpec((bm, in_p), lambda i: (i, 0)),      # x: batch-tiled
                resident((in_p, hid_p)), resident((1, hid_p)),   # W1, b1
                resident((hid_p, hid_p)), resident((1, hid_p)),  # W2, b2
                resident((hid_p, out_p)), resident((1, out_p)),  # W3, b3
            ],
            out_specs=pl.BlockSpec((bm, out_p), lambda i: (i, 0)),
        ),
        compiler_params=pltpu.CompilerParams(
            dimension_semantics=("parallel",),   # megacore sharding on v7x
            vmem_limit_bytes=vmem_limit,
        ),
        cost_estimate=cost,
    )(x_p, w1_p, b1_p, w2_p, b2_p, w3_p, b3_p)

    return out_padded[:B, :num_classes]


def reference_forward_f32(x, w1, b1, w2, b2, w3, b3):
    h1 = jnp.maximum(x @ w1 + b1, 0.0)
    h2 = jnp.maximum(h1 @ w2 + b2, 0.0)
    return h2 @ w3 + b3


def reference_forward_bf16(x, w1, b1, w2, b2, w3, b3):
    """Same precision recipe as the kernel: bf16 operands, f32 accumulation."""
    cd = jnp.bfloat16
    h1 = jnp.maximum(
        jnp.dot(x.astype(cd), w1.astype(cd),
                preferred_element_type=jnp.float32) + b1, 0.0)
    h2 = jnp.maximum(
        jnp.dot(h1.astype(cd), w2.astype(cd),
                preferred_element_type=jnp.float32) + b2, 0.0)
    return jnp.dot(h2.astype(cd), w3.astype(cd),
                   preferred_element_type=jnp.float32) + b3


if __name__ == "__main__":
    # Sizes consistent with NeuralNet(input_size, hidden_size, num_classes).
    batch = 8
    input_size = 32
    hidden_size = 64
    num_classes = 16

    key = jax.random.PRNGKey(0)
    kx, k1, k2, k3, kb1, kb2, kb3 = jax.random.split(key, 7)

    x = jax.random.normal(kx, (batch, input_size), dtype=jnp.float32)

    # PyTorch nn.Linear stores weight as (out, in); create that way then
    # transpose to (in, out) for the kernel's x @ W convention.
    w1_pt = jax.random.normal(k1, (hidden_size, input_size), jnp.float32) * 0.1
    w2_pt = jax.random.normal(k2, (hidden_size, hidden_size), jnp.float32) * 0.1
    w3_pt = jax.random.normal(k3, (num_classes, hidden_size), jnp.float32) * 0.1
    b1 = jax.random.normal(kb1, (hidden_size,), jnp.float32) * 0.1
    b2 = jax.random.normal(kb2, (hidden_size,), jnp.float32) * 0.1
    b3 = jax.random.normal(kb3, (num_classes,), jnp.float32) * 0.1

    w1, w2, w3 = w1_pt.T, w2_pt.T, w3_pt.T

    # One-time weight padding/casting (hoisted out of the forward).
    params = prepare_params(w1, b1, w2, b2, w3, b3)
    params = jax.block_until_ready(params)

    out = neural_net_forward(x, *params, num_classes=num_classes)
    out = jax.block_until_ready(out)
    assert out.shape == (batch, num_classes)

    # Check against a precision-matched (bf16 operands, f32 accum) reference...
    ref_bf16 = reference_forward_bf16(x, w1, b1, w2, b2, w3, b3)
    assert jnp.allclose(out, ref_bf16, atol=1e-2, rtol=1e-2), \
        "mismatch vs bf16-matched reference"

    # ...and sanity-check against the pure f32 reference with bf16-level slack.
    ref_f32 = reference_forward_f32(x, w1, b1, w2, b2, w3, b3)
    assert jnp.allclose(out, ref_f32, atol=5e-2, rtol=5e-2), \
        "mismatch vs f32 reference"

    print("KERNEL_OK")
</pallas_src>

<mosaic_0001>
module attributes {stable_mosaic.version = 11 : i64} {
  func.func @mlp_kernel(%arg0: i32, %arg1: memref<16x32xbf16, #tpu.memory_space<vmem>>, %arg2: memref<32x128xbf16, #tpu.memory_space<vmem>>, %arg3: memref<1x128xf32, #tpu.memory_space<vmem>>, %arg4: memref<128x128xbf16, #tpu.memory_space<vmem>>, %arg5: memref<1x128xf32, #tpu.memory_space<vmem>>, %arg6: memref<128x128xbf16, #tpu.memory_space<vmem>>, %arg7: memref<1x128xf32, #tpu.memory_space<vmem>>, %arg8: memref<16x128xf32, #tpu.memory_space<vmem>>) attributes {dimension_semantics = [#tpu.dimension_semantics<parallel>], iteration_bounds = array<i64: 1>, scalar_prefetch = 0 : i64, scratch_operands = 0 : i64, tpu.core_type = #tpu.core_type<tc>, window_params = [{transform_indices = @transform_0, window_bounds = array<i64: 16, 32>}, {pipeline_mode = #tpu.pipeline_mode<synchronous>, transform_indices = @transform_1, window_bounds = array<i64: 32, 128>}, {pipeline_mode = #tpu.pipeline_mode<synchronous>, transform_indices = @transform_2, window_bounds = array<i64: 1, 128>}, {pipeline_mode = #tpu.pipeline_mode<synchronous>, transform_indices = @transform_3, window_bounds = array<i64: 128, 128>}, {pipeline_mode = #tpu.pipeline_mode<synchronous>, transform_indices = @transform_4, window_bounds = array<i64: 1, 128>}, {pipeline_mode = #tpu.pipeline_mode<synchronous>, transform_indices = @transform_5, window_bounds = array<i64: 128, 128>}, {pipeline_mode = #tpu.pipeline_mode<synchronous>, transform_indices = @transform_6, window_bounds = array<i64: 1, 128>}, {transform_indices = @transform_7, window_bounds = array<i64: 16, 128>}]} {
    %c0 = arith.constant 0 : index
    %c0_0 = arith.constant 0 : index
    %0 = vector.load %arg1[%c0, %c0_0] : memref<16x32xbf16, #tpu.memory_space<vmem>>, vector<16x32xbf16>
    %c0_1 = arith.constant 0 : index
    %c0_2 = arith.constant 0 : index
    %1 = vector.load %arg2[%c0_1, %c0_2] : memref<32x128xbf16, #tpu.memory_space<vmem>>, vector<32x128xbf16>
    %cst = arith.constant dense<0.000000e+00> : vector<16x128xf32>
    %2 = tpu.matmul %0, %1, %cst {dimension_numbers = #tpu.dot_dimension_numbers<[1], [0], [0], [1], [0, 0, 1, 1], [], []>} : vector<16x32xbf16>, vector<32x128xbf16>, vector<16x128xf32> -> vector<16x128xf32>
    %c0_3 = arith.constant 0 : index
    %c0_4 = arith.constant 0 : index
    %3 = vector.load %arg3[%c0_3, %c0_4] : memref<1x128xf32, #tpu.memory_space<vmem>>, vector<1x128xf32>
    %4 = vector.broadcast %3 : vector<1x128xf32> to vector<16x128xf32>
    %5 = arith.addf %2, %4 : vector<16x128xf32>
    %cst_5 = arith.constant 0.000000e+00 : f32
    %6 = vector.broadcast %cst_5 : f32 to vector<16x128xf32>
    %7 = arith.maximumf %5, %6 : vector<16x128xf32>
    %8 = arith.truncf %7 : vector<16x128xf32> to vector<16x128xbf16>
    %c0_6 = arith.constant 0 : index
    %c0_7 = arith.constant 0 : index
    %9 = vector.load %arg4[%c0_6, %c0_7] : memref<128x128xbf16, #tpu.memory_space<vmem>>, vector<128x128xbf16>
    %cst_8 = arith.constant dense<0.000000e+00> : vector<16x128xf32>
    %10 = tpu.matmul %8, %9, %cst_8 {dimension_numbers = #tpu.dot_dimension_numbers<[1], [0], [0], [1], [0, 0, 1, 1], [], []>} : vector<16x128xbf16>, vector<128x128xbf16>, vector<16x128xf32> -> vector<16x128xf32>
    %c0_9 = arith.constant 0 : index
    %c0_10 = arith.constant 0 : index
    %11 = vector.load %arg5[%c0_9, %c0_10] : memref<1x128xf32, #tpu.memory_space<vmem>>, vector<1x128xf32>
    %12 = vector.broadcast %11 : vector<1x128xf32> to vector<16x128xf32>
    %13 = arith.addf %10, %12 : vector<16x128xf32>
    %cst_11 = arith.constant 0.000000e+00 : f32
    %14 = vector.broadcast %cst_11 : f32 to vector<16x128xf32>
    %15 = arith.maximumf %13, %14 : vector<16x128xf32>
    %16 = arith.truncf %15 : vector<16x128xf32> to vector<16x128xbf16>
    %c0_12 = arith.constant 0 : index
    %c0_13 = arith.constant 0 : index
    %17 = vector.load %arg6[%c0_12, %c0_13] : memref<128x128xbf16, #tpu.memory_space<vmem>>, vector<128x128xbf16>
    %cst_14 = arith.constant dense<0.000000e+00> : vector<16x128xf32>
    %18 = tpu.matmul %16, %17, %cst_14 {dimension_numbers = #tpu.dot_dimension_numbers<[1], [0], [0], [1], [0, 0, 1, 1], [], []>} : vector<16x128xbf16>, vector<128x128xbf16>, vector<16x128xf32> -> vector<16x128xf32>
    %c0_15 = arith.constant 0 : index
    %c0_16 = arith.constant 0 : index
    %19 = vector.load %arg7[%c0_15, %c0_16] : memref<1x128xf32, #tpu.memory_space<vmem>>, vector<1x128xf32>
    %20 = vector.broadcast %19 : vector<1x128xf32> to vector<16x128xf32>
    %21 = arith.addf %18, %20 : vector<16x128xf32>
    %c0_17 = arith.constant 0 : index
    %c0_18 = arith.constant 0 : index
    %22 = vector.load %arg8[%c0_17, %c0_18] : memref<16x128xf32, #tpu.memory_space<vmem>>, vector<16x128xf32>
    tpu.vector_store %arg8[%c0_17, %c0_18], %21 {strides = array<i32>} : memref<16x128xf32, #tpu.memory_space<vmem>>, vector<16x128xf32>,
    return
  }
  func.func @transform_0(%arg0: i32) -> (i32, i32) {
    %c0_i32 = arith.constant 0 : i32
    %c0_i32_0 = arith.constant 0 : i32
    return %arg0, %c0_i32 : i32, i32
  }
  func.func @transform_1(%arg0: i32) -> (i32, i32) {
    %c0_i32 = arith.constant 0 : i32
    %c0_i32_0 = arith.constant 0 : i32
    %c0_i32_1 = arith.constant 0 : i32
    return %c0_i32, %c0_i32_0 : i32, i32
  }
  func.func @transform_2(%arg0: i32) -> (i32, i32) {
    %c0_i32 = arith.constant 0 : i32
    %c0_i32_0 = arith.constant 0 : i32
    %c0_i32_1 = arith.constant 0 : i32
    return %c0_i32, %c0_i32_0 : i32, i32
  }
  func.func @transform_3(%arg0: i32) -> (i32, i32) {
    %c0_i32 = arith.constant 0 : i32
    %c0_i32_0 = arith.constant 0 : i32
    %c0_i32_1 = arith.constant 0 : i32
    return %c0_i32, %c0_i32_0 : i32, i32
  }
  func.func @transform_4(%arg0: i32) -> (i32, i32) {
    %c0_i32 = arith.constant 0 : i32
    %c0_i32_0 = arith.constant 0 : i32
    %c0_i32_1 = arith.constant 0 : i32
    return %c0_i32, %c0_i32_0 : i32, i32
  }
  func.func @transform_5(%arg0: i32) -> (i32, i32) {
    %c0_i32 = arith.constant 0 : i32
    %c0_i32_0 = arith.constant 0 : i32
    %c0_i32_1 = arith.constant 0 : i32
    return %c0_i32, %c0_i32_0 : i32, i32
  }
  func.func @transform_6(%arg0: i32) -> (i32, i32) {
    %c0_i32 = arith.constant 0 : i32
    %c0_i32_0 = arith.constant 0 : i32
    %c0_i32_1 = arith.constant 0 : i32
    return %c0_i32, %c0_i32_0 : i32, i32
  }
  func.func @transform_7(%arg0: i32) -> (i32, i32) {
    %c0_i32 = arith.constant 0 : i32
    %c0_i32_0 = arith.constant 0 : i32
    return %arg0, %c0_i32 : i32, i32
  }
}

</mosaic_0001>

<bundles_post_ra>
// kernel: neural_net_forward.1
= control target key start
LH: loop header
LB: loop body
LE: loop exit
PB: predicated region body
PF: predicated region fallthrough
CT: control target
= control target key end

     0   :  { %12 = vsyncpa [#allocation3], 0  ;;  %s511_s0 = inlined_call_operand.vmem [shape: bf16[16,32], index: 0, kind: input, shape index: {}]   ;;  %s512_s1 = inlined_call_operand.vmem [shape: bf16[32,128], index: 1, kind: input, shape index: {}]   ;;  %s513_s2 = inlined_call_operand.vmem [shape: f32[1,128], index: 2, kind: input, shape index: {}]   ;;  %s514_s3 = inlined_call_operand.hbm [shape: bf16[128,128], index: 3, kind: input, shape index: {}]   ;;  %s515_s4 = inlined_call_operand.vmem [shape: f32[1,128], index: 4, kind: input, shape index: {}]   ;;  %s516_s5 = inlined_call_operand.hbm [shape: bf16[128,128], index: 5, kind: input, shape index: {}]   ;;  %s517_s6 = inlined_call_operand.vmem [shape: f32[1,128], index: 6, kind: input, shape index: {}]   ;;  %s518_s7 = inlined_call_operand.vmem [shape: f32[16,128], index: 7, kind: output, shape index: {}]  }
   0x1   :  { %s24_s26 = sshll.u32 %s514_s3, 4  ;;  %s25_s26 = int_to_ptr.hbm [resolvable:$true] %s24_s26 }
   0x2   :  { %13 = vsyncpa [#allocation5], 0  ;;  %s437_s27 = smov [#allocation2]   ;;  %s39_s8 = sshll.u32 %s516_s5, 4  ;;  %s40_s8 = int_to_ptr.hbm [resolvable:$true] %s39_s8 }
   0x3   :  { %s26_s28 = sshll.u32 %s437_s27, 4  ;;  %s438_s9 = smov 64   ;;  %s27_s28 = int_to_ptr.vmem [resolvable:$true] %s26_s28 }
   0x4   :  { %s439_s10 = smov 4   ;;  %s440_s11 = smov [#allocation4]  }
   0x5   :  { %32 = dma.hbm_to_vmem [thread:$0]  %s25_s26, 1024, %s27_s28, [#allocation3], %s438_s9, %s438_s9, %s439_s10  }
   0x6   :  { %s41_s12 = sshll.u32 %s440_s11, 4  ;;  %s42_s12 = int_to_ptr.vmem [resolvable:$true] %s41_s12 }
   0x7   :  { %47 = dma.hbm_to_vmem [thread:$0]  %s40_s8, 1024, %s42_s12, [#allocation5], %s438_s9, %s438_s9, %s439_s10  }
   0x8   :  { %433 = dma.done.wait [#allocation3], 1024  }
   0x9   :  { %434 = vsyncadd [#allocation3], 4294966272 }
   0xa   :  { %435 = dma.done.wait [#allocation5], 1024  }
   0xb   :  { %436 = vsyncadd [#allocation5], 4294966272  ;;  %v361_v0 = vld [vmem:[%s512_s1 + $0x8] sm:$0xff]  ;;  %v369_v1 = vld [vmem:[#allocation2 + $0x38] sm:$0xff]  ;;  %vm86_vm0 = vcmask 261120  }
   0xc   :  { %96 = vmatpush.bf16.msra.mxu0 %v361_v0  ;;  %v360_v2 = vld [vmem:[%s512_s1] sm:$0xff]  ;;  %175 = vmatpush.bf16.msra.mxu1 %v369_v1  ;;  %v368_v3 = vld [vmem:[#allocation2 + $0x30] sm:$0xff]  ;;  %v367_v5 = vld [vmem:[#allocation2 + $0x28] sm:$0xff] }
   0xd   :  { %v359_v4 = vld [vmem:[%s511_s0] sm:$0xff]  ;;  %v365_v7 = vld [vmem:[#allocation2 + $0x18] sm:$0xff]  ;;  %v364_v8 = vld [vmem:[#allocation2 + $0x10] sm:$0xff] }
   0xe   :  { %v366_v6 = vld [vmem:[#allocation2 + $0x20] sm:$0xff]  ;;  %v363_v9 = vld [vmem:[#allocation2 + $0x8] sm:$0xff]  ;;  %v377_v11 = vld [vmem:[#allocation4 + $0x38] sm:$0xff] }
   0xf   :  { %v362_v10 = vld [vmem:[#allocation2] sm:$0xff]  ;;  %260 = vmatpush.bf16.msra.mxu2 %v377_v11  ;;  %v376_v12 = vld [vmem:[#allocation4 + $0x30] sm:$0xff]  ;;  %v375_v13 = vld [vmem:[#allocation4 + $0x28] sm:$0xff] }
  0x10   :  { %97 = vmatpush.bf16.msra.mxu0 %v360_v2  ;;  %176 = vmatpush.bf16.msra.mxu1 %v368_v3  ;;  %v374_v14 = vld [vmem:[#allocation4 + $0x20] sm:$0xff]  ;;  %v373_v23 = vld [vmem:[#allocation4 + $0x18] sm:$0xff]  ;;  %v372_v24 = vld [vmem:[#allocation4 + $0x10] sm:$0xff] }
  0x11   :  { %v382_v16 = vld [vmem:[%s513_s2] ss:$0 sm:$0xff]  ;;  %v371_v25 = vld [vmem:[#allocation4 + $0x8] sm:$0xff] }
  0x12   :  { %v370_v26 = vld [vmem:[#allocation4] sm:$0xff] }
  0x13   :  { %294 = vmatmul.msk.bf16.vlgmr.msra.gmra.mxu0 %vm86_vm0, %v359_v4  ;;  %261 = vmatpush.bf16.msra.mxu2 %v376_v12  ;;  %v383_v28 = vld [vmem:[%s515_s4] ss:$0 sm:$0xff] }
  0x14   :  { %177 = vmatpush.bf16.msra.mxu1 %v367_v5  ;;  %v384_v35 = vld [vmem:[%s517_s6] ss:$0 sm:$0xff] }
  0x17   :  { %262 = vmatpush.bf16.msra.mxu2 %v375_v13 }
  0x18   :  { %178 = vmatpush.bf16.msra.mxu1 %v366_v6 }
  0x1b   :  { %263 = vmatpush.bf16.msra.mxu2 %v374_v14 }
  0x1c   :  { %179 = vmatpush.bf16.msra.mxu1 %v365_v7 }
  0x1f   :  { %264 = vmatpush.bf16.msra.mxu2 %v373_v23 }
  0x20   :  { %180 = vmatpush.bf16.msra.mxu1 %v364_v8 }
  0x23   :  { %265 = vmatpush.bf16.msra.mxu2 %v372_v24 }
  0x24   :  { %181 = vmatpush.bf16.msra.mxu1 %v363_v9 }
  0x27   :  { %266 = vmatpush.bf16.msra.mxu2 %v371_v25 }
  0x28   :  { %182 = vmatpush.bf16.msra.mxu1 %v362_v10 }
  0x2b   :  { %267 = vmatpush.bf16.msra.mxu2 %v370_v26 }
  0x90   :  { %v99_v15 = vpop.f32.mrf.mxu0 }
  0x91   :  { %v100_v17 = vadd.f32 %v382_v16, %v99_v15 }
  0x93   :  { %v104_v20 = vmax.f32 %v100_v17, 0.0 }
  0x98   :  { %v101_v18 = vpop.f32.mrf.mxu0 }
  0x99   :  { %v102_v19 = vadd.f32 %v382_v16, %v101_v18 }
  0x9b   :  { %v105_v21 = vmax.f32 %v102_v19, 0.0 }
  0x9d   :  { %v106_v22 = vpack.c.bf16 %v105_v21, %v104_v20 }
  0x9f   :  { %183 = vmatmul.bf16.vlgmr.msra.gmra.mxu1 %v106_v22 }
 0x11c   :  { %v184_v27 = vpop.f32.mrf.mxu1 }
 0x11d   :  { %v185_v29 = vadd.f32 %v383_v28, %v184_v27 }
 0x11f   :  { %v189_v32 = vmax.f32 %v185_v29, 0.0 }
 0x124   :  { %v186_v30 = vpop.f32.mrf.mxu1 }
 0x125   :  { %v187_v31 = vadd.f32 %v383_v28, %v186_v30 }
 0x127   :  { %v190_v33 = vmax.f32 %v187_v31, 0.0 }
 0x129   :  { %v191_v34 = vpack.c.bf16 %v190_v33, %v189_v32 }
 0x12b   :  { %268 = vmatmul.bf16.vlgmr.msra.gmra.mxu2 %v191_v34 }
 0x1ae   :  { %v269_v36 = vpop.f32.mrf.mxu2 }
 0x1af   :  { %v270_v37 = vadd.f32 %v384_v35, %v269_v36 }
 0x1b1   :  { %274 = vst [vmem:[%s518_s7] sm:$0xff] %v270_v37 }
 0x1b6   :  { %v271_v38 = vpop.f32.mrf.mxu2 }
 0x1b7   :  { %v272_v39 = vadd.f32 %v384_v35, %v271_v38 }
 0x1b9   :  { %275 = vst [vmem:[%s518_s7 + $0x8] sm:$0xff] %v272_v39 }
 0x1ba   :  { %280 = vsyncpa [#allocation3], 1 }
 0x1bb   :  { %281 = vsyncpa [#allocation5], 1 }

</bundles_post_ra>
